<compile_context>
chip_gen: v6e
topology: v6e:2x2x1
jax: 0.10.0
libtpu: 0.0.40
codegen_flags: <defaults>
</compile_context>

<pallas_src>
import math

import jax
import jax.numpy as jnp
from jax.experimental import pallas as pl
from jax.experimental.pallas import tpu as pltpu


def _round_up(v, m):
    return ((v + m - 1) // m) * m


def _choose_tiles(n, tm_max=512, tk_max=4096):
    """Pick (tm, tk, n_rows, n_cols) for the A_hat stream.

    tk up to 4096 -> 4 MiB bf16 A tiles at the defaults (v5e-safe when
    double-buffered, far under v7x's 64 MiB/TC VMEM).  tm is chosen so the row
    grid has >= 2 blocks whenever possible, so the "parallel" row axis can
    shard across v7x's 2 TensorCores.
    """
    tk = min(tk_max, _round_up(n, 128))
    n_cols = _round_up(n, tk)
    tm = min(tm_max, _round_up(n, 8))
    if n > 8 and _round_up(n, tm) // tm < 2:
        tm = _round_up((n + 1) // 2, 8)        # split rows across 2 TCs
    n_rows = _round_up(n, tm)
    return tm, tk, n_rows, n_cols


# ----------------------------- Pallas kernel -------------------------------

def _gcn_score_kernel(a_ref, xw_ref, b_ref, score_ref, acc_ref):
    """One (row-tile, k-tile) step of  score = A_hat @ xw + b.

    a_ref    : (TM, TK) bf16 tile of A_hat (streamed, double-buffered).
    xw_ref   : (n_k, TK) f32 table of xw = x @ W; constant index_map, so it is
               fetched from HBM once and stays VMEM-resident for the grid.
    b_ref    : (1,) f32 bias in SMEM.
    score_ref: (TM, 1) f32 output block (written once, at the last k step).
    acc_ref  : (TM, 128) f32 lane-dense accumulator, resident across the k axis.
    """
    k = pl.program_id(1)
    tk = a_ref.shape[1]

    @pl.when(k == 0)
    def _init():
        acc_ref[...] = jnp.zeros_like(acc_ref)

    xw_row = xw_ref[pl.ds(k, 1), :]            # (1, TK) f32, already in VMEM

    def chunk(j0):
        # Static 128-lane slice: convert + broadcast-multiply, pure VPU work,
        # with bounded (TM, 128) f32 intermediates even for multi-MiB A tiles.
        a_j = a_ref[:, j0:j0 + 128].astype(jnp.float32)    # (TM, 128)
        return a_j * xw_row[:, j0:j0 + 128]

    partial = chunk(0)
    for j0 in range(128, tk, 128):             # static unroll, VALU adds only
        partial = partial + chunk(j0)
    acc_ref[...] += partial

    @pl.when(k == pl.num_programs(1) - 1)
    def _finalize():
        # Single cross-lane (XLU) reduce + masked (TM, 1) store per row tile.
        score_ref[...] = (jnp.sum(acc_ref[...], axis=-1, keepdims=True)
                          + b_ref[0])


def gcn_score_pallas(a_pad, xw, b, num_nodes, *, tm, tk):
    """score = A_hat @ xw + b via the tiled Pallas kernel.

    a_pad: (n_rows, n_cols) bf16 zero-padded normalized adjacency.
    xw   : (num_nodes,) f32 precomputed x @ W.
    b    : (1,) f32 bias.
    """
    n_rows, n_cols = a_pad.shape
    assert n_rows % tm == 0 and n_cols % tk == 0
    n_k = n_cols // tk

    # Zero-padded, lane-dense xw table; one (1, tk) row per reduction step.
    xw_p = jnp.pad(xw.astype(jnp.float32), (0, n_cols - num_nodes))
    xw_p = xw_p.reshape(n_k, tk)

    grid = (n_rows // tm, n_k)
    bytes_accessed = n_rows * n_cols * 2 + n_cols * 4 + n_rows * 4

    score_p = pl.pallas_call(
        _gcn_score_kernel,
        out_shape=jax.ShapeDtypeStruct((n_rows, 1), jnp.float32),
        grid_spec=pltpu.PrefetchScalarGridSpec(
            num_scalar_prefetch=0,
            grid=grid,
            in_specs=[
                pl.BlockSpec((tm, tk), lambda i, k: (i, k)),        # A_hat tile
                pl.BlockSpec((n_k, tk), lambda i, k: (0, 0)),       # xw, resident
                pl.BlockSpec(memory_space=pltpu.MemorySpace.SMEM),  # bias
            ],
            out_specs=pl.BlockSpec((tm, 1), lambda i, k: (i, 0)),
            scratch_shapes=[pltpu.VMEM((tm, 128), jnp.float32)],
        ),
        compiler_params=pltpu.CompilerParams(
            dimension_semantics=("parallel", "arbitrary"),
            vmem_limit_bytes=32 * 1024 * 1024),
        cost_estimate=pl.CostEstimate(
            flops=2 * n_rows * n_cols,
            transcendentals=0,
            bytes_accessed=bytes_accessed),
    )(a_pad, xw_p, b.astype(jnp.float32))
    return score_p[:num_nodes, 0]


# ------------------------------ JAX glue ------------------------------------

def gcn_normalized_adjacency_bf16(edge_index, num_nodes, n_rows, n_cols):
    """Dense GCN-normalized adjacency D^-1/2 (A + I) D^-1/2, built directly as
    a zero-padded (n_rows, n_cols) bf16 array (single N^2*2B HBM write instead
    of f32 build + cast + pad passes).

    Matches PyG gcn_norm(add_self_loops=True): existing self-loops are dropped
    and a fresh weight-1 self-loop is added for every node (no double count).
    """
    # TODO(synk): for genuinely sparse graphs replace the dense O(N^2) A_hat
    # with an edge-list/CSR SpMV of xw driven by PrefetchScalarGridSpec.
    src, dst = edge_index[0], edge_index[1]
    not_loop = (src != dst).astype(jnp.float32)
    deg = jnp.zeros((num_nodes,), jnp.float32).at[dst].add(not_loop) + 1.0
    dinv = jax.lax.rsqrt(deg)
    w_edge = (not_loop * dinv[src] * dinv[dst]).astype(jnp.bfloat16)
    a = jnp.zeros((n_rows, n_cols), jnp.bfloat16)
    # row = target, col = source so that score = A_hat @ xw aggregates into targets.
    a = a.at[dst, src].add(w_edge)
    idx = jnp.arange(num_nodes)
    a = a.at[idx, idx].add((dinv * dinv).astype(jnp.bfloat16))   # self-loops
    return a


def sagpool_forward(x, edge_index, w, b, ratio=0.8, batch=None, *,
                    tm_max=512, tk_max=4096):
    """Mirrors SAGPool.forward.  Returns (x_out, edge_index_out, edge_attr,
    batch_out, perm, num_edges_kept)."""
    n = x.shape[0]
    if batch is None:
        batch = jnp.zeros((n,), dtype=edge_index.dtype)

    tm, tk, n_rows, n_cols = _choose_tiles(n, tm_max, tk_max)
    a_pad = gcn_normalized_adjacency_bf16(edge_index, n, n_rows, n_cols)

    # GCNConv linear part: tiny (N, C) x (C, 1) GEMV, precomputed so the Pallas
    # kernel stays purely A_hat-bandwidth-bound.
    xw = (x @ w)[:, 0]

    # ---- Pallas kernel: score = A_hat @ xw + b (bf16 A stream) --------------
    score = gcn_score_pallas(a_pad, xw, b, n, tm=tm, tk=tk)

    # ---- top-k node selection (single graph since batch is all zeros) -------
    # TODO(synk): per-graph segmented top-k for multi-graph batches.
    k = int(math.ceil(ratio * n))
    _, perm = jax.lax.top_k(score, k)
    perm = perm.astype(jnp.int32)

    # Gate only the k kept rows — identical to x[perm]*tanh(score[perm]).view(-1,1).
    x_out = x[perm] * jnp.tanh(score[perm])[:, None]
    batch_out = batch[perm]

    # ---- filter_adj: keep edges with both endpoints selected, remap indices --
    # TODO(synk): PyTorch returns a dynamically sized edge list; here we return
    # a fixed-size edge_index padded with -1 plus the number of valid edges.
    mask = jnp.zeros((n,), bool).at[perm].set(True)
    new_idx = jnp.full((n,), -1, jnp.int32).at[perm].set(
        jnp.arange(k, dtype=jnp.int32))
    row, col = edge_index[0], edge_index[1]
    keep = mask[row] & mask[col]
    order = jnp.argsort(jnp.where(keep, 0, 1), stable=True)   # kept edges first
    row2 = jnp.where(keep, new_idx[row], -1)[order]
    col2 = jnp.where(keep, new_idx[col], -1)[order]
    edge_index_out = jnp.stack([row2, col2])
    num_kept = keep.sum()

    return x_out, edge_index_out, None, batch_out, perm, num_kept


# ------------------------------- demo ---------------------------------------

if __name__ == "__main__":
    key = jax.random.PRNGKey(0)
    k_x, k_e, k_w = jax.random.split(key, 3)

    N, C, E = 160, 32, 480      # nodes, in_channels, edges
    ratio = 0.8

    x = jax.random.normal(k_x, (N, C), dtype=jnp.float32)
    edge_index = jax.random.randint(k_e, (2, E), 0, N, dtype=jnp.int32)

    # GCNConv(in_channels, 1) parameters, deterministic init.
    w = jax.random.normal(k_w, (C, 1), dtype=jnp.float32) / jnp.sqrt(float(C))
    b = jnp.zeros((1,), dtype=jnp.float32)

    xw = (x @ w)[:, 0]

    # --- correctness of the Pallas score kernel vs plain JAX, two tilings ----
    for tm_cap, tk_cap in ((64, 128),      # multi-step (row, k) grid
                           (512, 4096)):   # production defaults (1 k step, 2 row blocks)
        tm, tk, n_rows, n_cols = _choose_tiles(N, tm_cap, tk_cap)
        a_pad = gcn_normalized_adjacency_bf16(edge_index, N, n_rows, n_cols)
        score_kernel = gcn_score_pallas(a_pad, xw, b, N, tm=tm, tk=tk)
        score_ref = jnp.dot(a_pad[:N, :N].astype(jnp.float32), xw,
                            precision=jax.lax.Precision.HIGHEST) + b[0]
        jax.block_until_ready((score_kernel, score_ref))
        assert score_kernel.shape == (N,)
        assert bool(jnp.allclose(score_kernel, score_ref, rtol=2e-2, atol=2e-2))

    # --- full SAGPool forward -------------------------------------------------
    out = sagpool_forward(x, edge_index, w, b, ratio=ratio)
    x_out, ei_out, ea_out, batch_out, perm, num_kept = out
    jax.block_until_ready((x_out, ei_out, batch_out, perm, num_kept))

    kk = int(math.ceil(ratio * N))
    assert x_out.shape == (kk, C)
    assert perm.shape == (kk,)
    assert batch_out.shape == (kk,)
    assert ei_out.shape == (2, E)

    print("KERNEL_OK")
</pallas_src>

<mosaic_0001>
module attributes {stable_mosaic.version = 11 : i64} {
  func.func @_gcn_score_kernel(%arg0: i32, %arg1: i32, %arg2: memref<64x128xbf16, #tpu.memory_space<vmem>>, %arg3: memref<2x128xf32, #tpu.memory_space<vmem>>, %arg4: memref<1xf32, #tpu.memory_space<smem>>, %arg5: memref<64x1xf32, #tpu.memory_space<vmem>>, %arg6: memref<64x128xf32, #tpu.memory_space<vmem>>) attributes {dimension_semantics = [#tpu.dimension_semantics<parallel>, #tpu.dimension_semantics<arbitrary>], iteration_bounds = array<i64: 3, 2>, scalar_prefetch = 0 : i64, scratch_operands = 1 : i64, tpu.core_type = #tpu.core_type<tc>, window_params = [{transform_indices = @transform_0, window_bounds = array<i64: 64, 128>}, {pipeline_mode = #tpu.pipeline_mode<synchronous>, transform_indices = @transform_1, window_bounds = array<i64: 2, 128>}, {transform_indices = @transform_2, window_bounds = array<i64: 1>}, {transform_indices = @transform_3, window_bounds = array<i64: 64, 1>}]} {
    %c0_i32 = arith.constant 0 : i32
    %0 = arith.cmpi eq, %arg1, %c0_i32 : i32
    %1 = arith.extui %0 : i1 to i32
    %c0_i32_0 = arith.constant 0 : i32
    %2 = arith.cmpi ne, %1, %c0_i32_0 : i32
    scf.if %2 {
      %cst = arith.constant 0.000000e+00 : f32
      %15 = vector.broadcast %cst : f32 to vector<64x128xf32>
      %c0_8 = arith.constant 0 : index
      %c0_9 = arith.constant 0 : index
      %16 = vector.load %arg6[%c0_8, %c0_9] : memref<64x128xf32, #tpu.memory_space<vmem>>, vector<64x128xf32>
      tpu.vector_store %arg6[%c0_8, %c0_9], %15 {strides = array<i32>} : memref<64x128xf32, #tpu.memory_space<vmem>>, vector<64x128xf32>,
    } else {
    }
    %3 = arith.index_cast %arg1 : i32 to index
    %c0 = arith.constant 0 : index
    %4 = vector.load %arg3[%3, %c0] : memref<2x128xf32, #tpu.memory_space<vmem>>, vector<1x128xf32>
    %c0_1 = arith.constant 0 : index
    %c0_2 = arith.constant 0 : index
    %5 = vector.load %arg2[%c0_1, %c0_2] : memref<64x128xbf16, #tpu.memory_space<vmem>>, vector<64x128xbf16>
    %6 = arith.extf %5 : vector<64x128xbf16> to vector<64x128xf32>
    %7 = vector.broadcast %4 : vector<1x128xf32> to vector<64x128xf32>
    %8 = arith.mulf %6, %7 : vector<64x128xf32>
    %c0_3 = arith.constant 0 : index
    %c0_4 = arith.constant 0 : index
    %9 = vector.load %arg6[%c0_3, %c0_4] : memref<64x128xf32, #tpu.memory_space<vmem>>, vector<64x128xf32>
    %10 = arith.addf %9, %8 : vector<64x128xf32>
    %c0_5 = arith.constant 0 : index
    %c0_6 = arith.constant 0 : index
    %11 = vector.load %arg6[%c0_5, %c0_6] : memref<64x128xf32, #tpu.memory_space<vmem>>, vector<64x128xf32>
    tpu.vector_store %arg6[%c0_5, %c0_6], %10 {strides = array<i32>} : memref<64x128xf32, #tpu.memory_space<vmem>>, vector<64x128xf32>,
    %c1_i32 = arith.constant 1 : i32
    %12 = arith.cmpi eq, %arg1, %c1_i32 : i32
    %13 = arith.extui %12 : i1 to i32
    %c0_i32_7 = arith.constant 0 : i32
    %14 = arith.cmpi ne, %13, %c0_i32_7 : i32
    scf.if %14 {
      %c0_8 = arith.constant 0 : index
      %c0_9 = arith.constant 0 : index
      %15 = vector.load %arg6[%c0_8, %c0_9] : memref<64x128xf32, #tpu.memory_space<vmem>>, vector<64x128xf32>
      %cst = arith.constant dense<0.000000e+00> : vector<64xf32>
      %16 = vector.multi_reduction <add>, %15, %cst [1] : vector<64x128xf32> to vector<64xf32>
      %17 = vector.shape_cast %16 : vector<64xf32> to vector<64x1xf32>
      %c0_10 = arith.constant 0 : index
      %18 = memref.load %arg4[%c0_10] : memref<1xf32, #tpu.memory_space<smem>>
      %19 = vector.broadcast %18 : f32 to vector<64x1xf32>
      %20 = arith.addf %17, %19 : vector<64x1xf32>
      %c0_11 = arith.constant 0 : index
      %c0_12 = arith.constant 0 : index
      %21 = vector.load %arg5[%c0_11, %c0_12] : memref<64x1xf32, #tpu.memory_space<vmem>>, vector<64x1xf32>
      tpu.vector_store %arg5[%c0_11, %c0_12], %20 {strides = array<i32>} : memref<64x1xf32, #tpu.memory_space<vmem>>, vector<64x1xf32>,
    } else {
    }
    return
  }
  func.func @transform_0(%arg0: i32, %arg1: i32) -> (i32, i32) {
    %c0_i32 = arith.constant 0 : i32
    return %arg0, %arg1 : i32, i32
  }
  func.func @transform_1(%arg0: i32, %arg1: i32) -> (i32, i32) {
    %c0_i32 = arith.constant 0 : i32
    %c0_i32_0 = arith.constant 0 : i32
    %c0_i32_1 = arith.constant 0 : i32
    return %c0_i32, %c0_i32_0 : i32, i32
  }
  func.func @transform_2(%arg0: i32, %arg1: i32) -> i32 {
    %c0_i32 = arith.constant 0 : i32
    %c0_i32_0 = arith.constant 0 : i32
    return %c0_i32 : i32
  }
  func.func @transform_3(%arg0: i32, %arg1: i32) -> (i32, i32) {
    %c0_i32 = arith.constant 0 : i32
    %c0_i32_0 = arith.constant 0 : i32
    return %arg0, %c0_i32 : i32, i32
  }
}

</mosaic_0001>

<bundles_post_ra>
// kernel: tpu_custom_call.1
= control target key start
LH: loop header
LB: loop body
LE: loop exit
PB: predicated region body
PF: predicated region fallthrough
CT: control target
= control target key end

     0   :  { %s793_s0 = inlined_call_operand.hbm [shape: bf16[192,256], index: 0, kind: input, shape index: {}]   ;;  %s794_s1 = inlined_call_operand.vmem [shape: f32[2,128], index: 1, kind: input, shape index: {}]   ;;  %s795_s2 = inlined_call_operand.<no memory space> [shape: f32[1], index: 2, kind: input, shape index: {}]   ;;  %s796_s3 = inlined_call_operand.vmem [shape: f32[192,1], index: 3, kind: output, shape index: {}]  }
   0x1   :  { %8 = sst [smem:[#allocation3]] %s795_s2 }
   0x2   :  { %9 = vsyncpa [#allocation5], 0 }
   0x3   :  { %11 = vsyncpa [#allocation5 + $0x1], 0  ;;  %s641_s14 = smov 0   ;;  %s643_s15 = smov 0  }
   0x4   :  { %s645_s16 = smov 0   ;;  %s647_s17 = smov 0  }
   0x5   :  { %s649_s18 = smov 0   ;;  %s651_s19 = smov 0  }
   0x6   :  { %s653_s20 = smov 0   ;;  %s655_s21 = smov 0  }
   0x7 LB: > { %s405_s2 = sadd.s32 4294967295, %s611_s21   ;;  %s26_s22 = sadd.s32 1, %s603_s19  ;;  %s611_s21 = sphi %s655_s21, %s17_s21   ;;  %s607_s20 = sphi %s653_s20, %s806_s20   ;;  %s603_s19 = sphi %s651_s19, %s805_s19   ;;  %s599_s18 = sphi %s649_s18, %s804_s18   ;;  %s595_s17 = sphi %s647_s17, %s803_s17   ;;  %s591_s16 = sphi %s645_s16, %s802_s16   ;;  %s587_s15 = sphi %s643_s15, %s801_s15   ;;  %s583_s14 = sphi %s641_s14, %s800_s14  }
   0x8   : > { %p27_p0 = scmp.ge.s32.totalorder %s26_s22, 2  ;;  %s29_s23 = sadd.s32 1, %s607_s20 }
   0x9   : > { %s38_s24 = sadd.s32 1, %s591_s16  ;;  %p45_p1 = scmp.ne.s32.totalorder %s591_s16, %s587_s15 }
   0xa   : > { %s808_s22 = smov (%p27_p0, %s26_s22), 0  ;;  %s810_s23 = smov (!%p27_p0, %s29_s23), %s607_s20 }
   0xb   : > { %s34_s25 = ssub.s32 %s603_s19, %s808_s22  ;;  %p46_p2 = scmp.eq.s32.totalorder %s611_s21, 0 }
   0xc   : > { %p31_p3 = scmp.ge.s32.totalorder %s810_s23, 3  ;;  %p51_p4 = scmp.ne.s32.totalorder %s587_s15, %s583_s14 }
   0xd   : > { %p692_p5 = por %p46_p2, %p45_p1  ;;  %p52_p6 = scmp.eq.s32.totalorder %s405_s2, 0 }
   0xe   : > { %s812_s23 = smov (%p31_p3, %s810_s23), 0  ;;  %p448_p8 = scmp.lt.s32.totalorder %s611_s21, 6 }
   0xf   : > { %p698_p7 = por %p52_p6, %p51_p4  ;;  %s33_s28 = ssub.s32 %s607_s20, %s812_s23 }
  0x10   : > { %s35_s29 = sor.u32 %s34_s25, %s33_s28  ;;  %s149_s30 = sand.u32 1, %s591_s16  }
  0x11   : > { %p36_p9 = scmp.eq.s32.totalorder %s35_s29, 0  ;;  %s409_s4 = sshll.u32 %s149_s30, 5 }
  0x12   : > { %s422_s5 = sshll.u32 %s607_s20, 4  ;;  %s153_s9 = scalar_lea.vmem [#allocation4], %s409_s4 }
  0x13   : > { %s708_s6 = scalar_select %p36_p9, %s591_s16, %s38_s24  }
  0x14   : > { %s159_s7 = sadd.s32 %s603_s19, %s422_s5  ;;  %s162_s10 = sshll.u32 %s153_s9, 4  ;;  %s163_s10 = int_to_ptr.vmem [resolvable:$true] %s162_s10 }
  0x15   : > { %s412_s8 = sshll.u32 %s159_s7, 6  ;;  %p718_p10 = pnand %p448_p8, %p692_p5 }
  0x16   : > { %s161_s13 = scalar_lea.hbm %s793_s0, %s412_s8  ;;  %p413_p11 = scmp.ge.s32.totalorder %s611_s21, 1 }
  0x17   : > { %s150_s2 = scalar_lea.sflag [#allocation5], %s149_s30  ;;  %p519_p12 = pneg %p718_p10 }
  0x18   : > { %s530_s24 = scalar_lea.vmem %s163_s10, 512  ;;  %s613_s25 = smov [#allocation4]  }
  0x19   : > { %p531_p13 = scmp.ne.s32.totalorder %s163_s10, %s530_s24  ;;  %s535_s28 = sshll.u32 %s613_s25, 4  ;;  %s536_s28 = int_to_ptr.vmem [resolvable:$false] %s535_s28 }
  0x1a   : > { %s537_s29 = scalar_lea.vmem %s536_s28, 1024  ;;  %p538_p2 = scmp.lt.s32.totalorder %s163_s10, %s536_s28 }
  0x1b   : > { %p533_p0 = pnand %p531_p13, %p519_p12  ;;  %p539_p3 = scmp.lt.s32.totalorder %s537_s29, %s530_s24 }
  0x1d   : > { %p534_p1 = pneg %p533_p0  ;;  %p540_p4 = por %p539_p3, %p538_p2 }
  0x1f   : > { %p541_p5 = pnand %p540_p4, %p534_p1 }
  0x21   : > { %544 = shalt.err (!%p541_p5)
}
  0x22   : > { %s614_s26 = smov 128   ;;  %s615_s30 = smov 64  }
  0x23   : > { %s616_s4 = smov 4   ;;  %p170_p6 = scmp.lt.s32.totalorder %s611_s21, 7 }
  0x24   : > { %447 = dma.hbm_to_vmem [thread:$0]  (!%p718_p10), %s161_s13, 512, %s163_s10, %s150_s2, %s614_s26, %s615_s30, %s616_s4  }
  0x25   : > { %p171_p8 = pnand %p413_p11, %p170_p6 }
  0x26   : > { %s176_s5 = sand.u32 (!%p171_p8), 1, %s587_s15  }
  0x27   : > { %174 = sbr.rel (%p171_p8) target bundleno = 226 (0xe2), region = 32  ;;  %s414_s7 = sshll.u32 (!%p171_p8), %s176_s5, 5 }
  0x28   : > { %s177_s8 = scalar_lea.sflag (!%p171_p8), [#allocation5], %s176_s5  ;;  %s731_s9 = scalar_lea.vmem (!%p171_p8), [#allocation4], %s414_s7 }
  0x2c   : > { %578 = dma.done.wait (%p698_p7), %s177_s8, 512  }
  0x2d   : > { %580 = vsyncadd (%p698_p7), %s177_s8, 4294966784  ;;  %s415_s11 = sshll.u32 %s599_s18, 3  ;;  %p417_p10 = scmp.ne.s32.totalorder %s595_s17, 0 }
  0x2e   : > { %p205_p9 = scmp.lt.s32.totalorder %s415_s11, 23 }
  0x2f   : > { %213 = sbr.rel (%p417_p10) target bundleno = 57 (0x39), region = 40 }
  0x30   : > { %s814_s11 = smov (!%p205_p9, %s415_s11), 23 }
  0x31   : > { %s416_s10 = sshll.u32 %s814_s11, 3 }
  0x32   : > { %s741_s14 = scalar_lea.vmem %s796_s3, %s416_s10 }
  0x34   : > { %v617_v0 = vmov 0.0  }
  0x35   : > { %214 = vst [vmem:[#allocation2 + $0x30] sm:$0xff] %v617_v0  ;;  %215 = vst [vmem:[#allocation2] sm:$0xff] %v617_v0 }
  0x36   : > { %216 = vst [vmem:[#allocation2 + $0x18] sm:$0xff] %v617_v0  ;;  %217 = vst [vmem:[#allocation2 + $0x10] sm:$0xff] %v617_v0 }
  0x37   : > { %218 = vst [vmem:[#allocation2 + $0x8] sm:$0xff] %v617_v0  ;;  %219 = vst [vmem:[#allocation2 + $0x20] sm:$0xff] %v617_v0 }
  0x38   : > { %220 = vst [vmem:[#allocation2 + $0x28] sm:$0xff] %v617_v0  ;;  %221 = vst [vmem:[#allocation2 + $0x38] sm:$0xff] %v617_v0 }
  0x39 PF: > { %s222_s2 = scalar_lea.vmem %s794_s1, %s595_s17  ;;  %v424_v1 = vld [vmem:[%s731_s9] sm:$0xff]   ;;  %v439_v5 = vld [vmem:[%s731_s9 + $0x8] sm:$0xff]   ;;  %v440_v10 = vld [vmem:[%s731_s9 + $0x10] sm:$0xff]   ;;  %p419_p7 = scmp.ne.s32.totalorder %s595_s17, 1 }
  0x3a   : > { %v418_v2 = vld [vmem:[%s222_s2] ss:$0 sm:$0xff]  ;;  %v425_v3 = vunpack.c.l.bf16 %v424_v1  ;;  %v426_v4 = vunpack.c.h.bf16 %v424_v1  ;;  %v429_v8 = vunpack.c.l.bf16 %v439_v5  ;;  %v430_v9 = vunpack.c.h.bf16 %v439_v5  ;;  %v441_v17 = vld [vmem:[%s731_s9 + $0x18] sm:$0xff]   ;;  %s304_s17 = sld [smem:[#allocation3]] (!%p419_p7) }
  0x3b   : > { %v433_v15 = vunpack.c.l.bf16 %v440_v10  ;;  %v434_v16 = vunpack.c.h.bf16 %v440_v10  ;;  %v437_v22 = vunpack.c.l.bf16 %v441_v17  ;;  %v438_v23 = vunpack.c.h.bf16 %v441_v17 }
  0x3c   : > { %v252_v6 = vld [vmem:[#allocation2 + $0x30] sm:$0xff]  ;;  %v253_v7 = vld [vmem:[#allocation2] sm:$0xff]  ;;  %v244_v11 = vmul.f32 %v425_v3, %v418_v2  ;;  %v245_v12 = vmul.f32 %v426_v4, %v418_v2  ;;  %v246_v18 = vmul.f32 %v429_v8, %v418_v2  ;;  %v247_v19 = vmul.f32 %v430_v9, %v418_v2 }
  0x3d   : > { %v254_v13 = vld [vmem:[#allocation2 + $0x18] sm:$0xff]  ;;  %v255_v14 = vld [vmem:[#allocation2 + $0x10] sm:$0xff]  ;;  %v248_v26 = vmul.f32 %v433_v15, %v418_v2  ;;  %v249_v27 = vmul.f32 %v434_v16, %v418_v2  ;;  %v250_v32 = vmul.f32 %v437_v22, %v418_v2  ;;  %v251_v33 = vmul.f32 %v438_v23, %v418_v2 }
  0x3e   : > { %v256_v20 = vld [vmem:[#allocation2 + $0x8] sm:$0xff]  ;;  %v257_v21 = vld [vmem:[#allocation2 + $0x20] sm:$0xff]  ;;  %v260_v24 = vadd.f32 %v252_v6, %v244_v11  ;;  %v261_v25 = vadd.f32 %v253_v7, %v245_v12  ;;  %v262_v30 = vadd.f32 %v254_v13, %v246_v18  ;;  %v263_v31 = vadd.f32 %v255_v14, %v247_v19 }
  0x3f   : > { %v258_v28 = vld [vmem:[#allocation2 + $0x28] sm:$0xff]  ;;  %v259_v29 = vld [vmem:[#allocation2 + $0x38] sm:$0xff]  ;;  %v264_v34 = vadd.f32 %v256_v20, %v248_v26  ;;  %v265_v35 = vadd.f32 %v257_v21, %v249_v27  ;;  %279 = sbr.rel (%p419_p7) target bundleno = 226 (0xe2), region = 44 }
  0x40   : > { %268 = vst [vmem:[#allocation2 + $0x30] sm:$0xff] %v260_v24  ;;  %269 = vst [vmem:[#allocation2] sm:$0xff] %v261_v25  ;;  %v266_v36 = vadd.f32 %v258_v28, %v250_v32  ;;  %v267_v37 = vadd.f32 %v259_v29, %v251_v33 }
  0x41   : > { %270 = vst [vmem:[#allocation2 + $0x18] sm:$0xff] %v262_v30  ;;  %271 = vst [vmem:[#allocation2 + $0x10] sm:$0xff] %v263_v31 }
  0x42   : > { %272 = vst [vmem:[#allocation2 + $0x8] sm:$0xff] %v264_v34  ;;  %273 = vst [vmem:[#allocation2 + $0x20] sm:$0xff] %v265_v35 }
  0x43   : > { %274 = vst [vmem:[#allocation2 + $0x28] sm:$0xff] %v266_v36  ;;  %275 = vst [vmem:[#allocation2 + $0x38] sm:$0xff] %v267_v37 }
  0x44   : > { %v305_v46 = vstv %s304_s17  ;;  %vm314_vm0 = vcmask 7168  }
  0x47   : > { %v280_v39 = vld [vmem:[#allocation2 + $0x30] sm:$0xff]  ;;  %v281_v41 = vld [vmem:[#allocation2] sm:$0xff] }
  0x48   : > { %v282_v38 = vld [vmem:[#allocation2 + $0x18] sm:$0xff]  ;;  %288 = vadd.xlane.f32.xlu0 %v280_v39  ;;  %v283_v40 = vld [vmem:[#allocation2 + $0x10] sm:$0xff] }
  0x49   : > { %292 = vadd.xlane.f32.xlu1 %v282_v38  ;;  %v285_v42 = vld [vmem:[#allocation2 + $0x20] sm:$0xff]  ;;  %v284_v43 = vld [vmem:[#allocation2 + $0x8] sm:$0xff] }
  0x4a   : > { %v287_v44 = vld [vmem:[#allocation2 + $0x38] sm:$0xff]  ;;  %v286_v45 = vld [vmem:[#allocation2 + $0x28] sm:$0xff] }
  0x4c   : > { %290 = vadd.xlane.f32.xlu0 %v281_v41 }
  0x4d   : > { %294 = vadd.xlane.f32.xlu1 %v283_v40 }
  0x50   : > { %296 = vadd.xlane.f32.xlu0 %v284_v43 }
  0x51   : > { %298 = vadd.xlane.f32.xlu1 %v285_v42 }
  0x54   : > { %300 = vadd.xlane.f32.xlu0 %v286_v45 }
  0x55   : > { %302 = vadd.xlane.f32.xlu1 %v287_v44 }
  0xd1   : > { %v289_v48 = vpop.xlane.xlu0 %288 }
  0xd2   : > { %v293_v47 = vpop.xlane.xlu1 %292  ;;  %v306_v50 = vadd.f32 %v305_v46, %v289_v48 }
  0xd3   : > { %v308_v49 = vadd.f32 %v305_v46, %v293_v47 }
  0xd4   : > { %315 = vst.msk [vmem:[%s741_s14] sm:$0xff] %vm314_vm0, %v306_v50 }
  0xd5   : > { %317 = vst.msk [vmem:[%s741_s14 + $0x10] sm:$0xff] %vm314_vm0, %v308_v49  ;;  %v291_v52 = vpop.xlane.xlu0 %290 }
  0xd6   : > { %v295_v51 = vpop.xlane.xlu1 %294  ;;  %v307_v54 = vadd.f32 %v305_v46, %v291_v52 }
  0xd7   : > { %v309_v53 = vadd.f32 %v305_v46, %v295_v51 }
  0xd8   : > { %316 = vst.msk [vmem:[%s741_s14 + $0x8] sm:$0xff] %vm314_vm0, %v307_v54 }
  0xd9   : > { %318 = vst.msk [vmem:[%s741_s14 + $0x18] sm:$0xff] %vm314_vm0, %v309_v53  ;;  %v297_v56 = vpop.xlane.xlu0 %296 }
  0xda   : > { %v299_v55 = vpop.xlane.xlu1 %298  ;;  %v310_v58 = vadd.f32 %v305_v46, %v297_v56 }
  0xdb   : > { %v311_v57 = vadd.f32 %v305_v46, %v299_v55 }
  0xdc   : > { %319 = vst.msk [vmem:[%s741_s14 + $0x20] sm:$0xff] %vm314_vm0, %v310_v58 }
  0xdd   : > { %320 = vst.msk [vmem:[%s741_s14 + $0x28] sm:$0xff] %vm314_vm0, %v311_v57  ;;  %v301_v60 = vpop.xlane.xlu0 %300 }
  0xde   : > { %v303_v59 = vpop.xlane.xlu1 %302  ;;  %v312_v62 = vadd.f32 %v305_v46, %v301_v60 }
  0xdf   : > { %v313_v61 = vadd.f32 %v305_v46, %v303_v59 }
  0xe0   : > { %321 = vst.msk [vmem:[%s741_s14 + $0x30] sm:$0xff] %vm314_vm0, %v312_v62 }
  0xe1   : > { %322 = vst.msk [vmem:[%s741_s14 + $0x38] sm:$0xff] %vm314_vm0, %v313_v61 }
  0xe2 PF: > { %s17_s21 = sadd.s32 1, %s611_s21   ;;  %s800_s14 = smov %s587_s15 }
  0xe3   : > { %p14_p11 = scmp.ge.s32.totalorder %s17_s21, 8   ;;  %s801_s15 = smov %s591_s16 }
  0xe4   : > { %s802_s16 = smov %s708_s6  ;;  %s803_s17 = smov %s603_s19 }
  0xe5   : > { %s804_s18 = smov %s607_s20  ;;  %s805_s19 = smov %s808_s22 }
  0xe6   : > { %s806_s20 = smov %s812_s23  ;;  %16 = sbr.rel (!%p14_p11) target bundleno = 7 (0x7), region = 81 }
  0xeb   :  { %345 = vsyncpa [#allocation5], 1 }
  0xec   :  { %347 = vsyncpa [#allocation5 + $0x1], 1 }

</bundles_post_ra>
